<compile_context>
chip_gen: v5e
topology: v5e:2x2
jax: 0.10.0
libtpu: 0.0.40
codegen_flags: <defaults>
</compile_context>

<pallas_src>
import functools
import math

import jax
import jax.numpy as jnp
from jax.experimental import pallas as pl
from jax.experimental.pallas import tpu as pltpu


def _round_up(v, m):
    return ((v + m - 1) // m) * m


def _vmem_limit_bytes(block_bytes):
    # BlockSpec double-buffers each operand; add slack, cap below v7x physical.
    return int(min(2 * block_bytes + (4 << 20), 48 << 20))


# ---------------------------------------------------------------------------
# Kernel 1: support = A @ W      (row-tiled over A; W whole & VMEM-resident)
# ---------------------------------------------------------------------------
def _matmul_kernel(a_ref, w_ref, o_ref):
    o_ref[...] = jnp.dot(
        a_ref[...], w_ref[...], preferred_element_type=jnp.float32
    ).astype(o_ref.dtype)


def _row_tiled_matmul(a, w, *, tile_m, out_dtype):
    m, k = a.shape
    _, n = w.shape
    out_itemsize = jnp.dtype(out_dtype).itemsize
    block_bytes = (
        tile_m * k * a.dtype.itemsize
        + k * n * w.dtype.itemsize
        + tile_m * n * out_itemsize
    )
    cost = pl.CostEstimate(
        flops=2 * m * k * n,
        transcendentals=0,
        bytes_accessed=(
            m * k * a.dtype.itemsize + k * n * w.dtype.itemsize + m * n * out_itemsize
        ),
    )
    return pl.pallas_call(
        _matmul_kernel,
        out_shape=jax.ShapeDtypeStruct((m, n), out_dtype),
        grid=(m // tile_m,),
        in_specs=[
            pl.BlockSpec((tile_m, k), lambda i: (i, 0)),
            pl.BlockSpec((k, n), lambda i: (0, 0)),
        ],
        out_specs=pl.BlockSpec((tile_m, n), lambda i: (i, 0)),
        compiler_params=pltpu.CompilerParams(
            dimension_semantics=("parallel",),
            vmem_limit_bytes=_vmem_limit_bytes(block_bytes),
        ),
        cost_estimate=cost,
    )(a, w)


# ---------------------------------------------------------------------------
# Kernel 2: out = act(adj_tile @ support + b)   (row-tiled over adj rows)
# ---------------------------------------------------------------------------
def _make_aggregate_kernel(activation):
    def kernel(adj_ref, s_ref, b_ref, o_ref):
        acc = jnp.dot(adj_ref[...], s_ref[...], preferred_element_type=jnp.float32)
        acc = acc + b_ref[...]  # fp32 bias broadcast (tail stays fp32)
        if activation == "relu":
            acc = jnp.maximum(acc, 0.0)
        else:  # "sigmoid"
            acc = jax.nn.sigmoid(acc)
        o_ref[...] = acc.astype(o_ref.dtype)

    return kernel


def _row_tiled_aggregate(adj, support, b, *, activation, tile_m, out_dtype):
    m, n_nodes = adj.shape
    _, f = support.shape
    out_itemsize = jnp.dtype(out_dtype).itemsize
    block_bytes = (
        tile_m * n_nodes * adj.dtype.itemsize
        + n_nodes * f * support.dtype.itemsize
        + f * b.dtype.itemsize
        + tile_m * f * out_itemsize
    )
    cost = pl.CostEstimate(
        flops=2 * m * n_nodes * f,
        transcendentals=(m * f if activation == "sigmoid" else 0),
        bytes_accessed=(
            m * n_nodes * adj.dtype.itemsize
            + n_nodes * f * support.dtype.itemsize
            + f * b.dtype.itemsize
            + m * f * out_itemsize
        ),
    )
    return pl.pallas_call(
        _make_aggregate_kernel(activation),
        out_shape=jax.ShapeDtypeStruct((m, f), out_dtype),
        grid=(m // tile_m,),
        in_specs=[
            pl.BlockSpec((tile_m, n_nodes), lambda i: (i, 0)),
            pl.BlockSpec((n_nodes, f), lambda i: (0, 0)),
            pl.BlockSpec((1, f), lambda i: (0, 0)),
        ],
        out_specs=pl.BlockSpec((tile_m, f), lambda i: (i, 0)),
        compiler_params=pltpu.CompilerParams(
            dimension_semantics=("parallel",),
            vmem_limit_bytes=_vmem_limit_bytes(block_bytes),
        ),
        cost_estimate=cost,
    )(adj, support, b)


# ---------------------------------------------------------------------------
# Full GCN forward
# ---------------------------------------------------------------------------
@functools.partial(jax.jit, static_argnames=("tile_n",))
def gcn_forward(x, adj, w1, b1, w2, b2, *, tile_n=128):
    n, nfeat = x.shape
    nhid = w1.shape[1]
    nclass = w2.shape[1]

    # Row tile: multiple of 8 sublanes, no bigger than the (padded) graph.
    tile_n = min(tile_n, _round_up(n, 8))
    n_p = _round_up(n, tile_n)
    nfeat_p = _round_up(nfeat, 128)
    nhid_p = _round_up(nhid, 128)
    nclass_p = _round_up(nclass, 128)

    # Zero-pad to lane/sublane-dense shapes; bf16 for all MXU operands.
    x_p = jnp.pad(x, ((0, n_p - n), (0, nfeat_p - nfeat))).astype(jnp.bfloat16)
    adj_p = jnp.pad(adj, ((0, n_p - n), (0, n_p - n))).astype(jnp.bfloat16)
    w1_p = jnp.pad(w1, ((0, nfeat_p - nfeat), (0, nhid_p - nhid))).astype(jnp.bfloat16)
    w2_p = jnp.pad(w2, ((0, nhid_p - nhid), (0, nclass_p - nclass))).astype(jnp.bfloat16)
    b1_p = jnp.pad(b1.reshape(1, -1), ((0, 0), (0, nhid_p - nhid))).astype(jnp.float32)
    b2_p = jnp.pad(b2.reshape(1, -1), ((0, 0), (0, nclass_p - nclass))).astype(jnp.float32)

    # Layer 1: h = relu(adj @ (x @ W1) + b1)
    support1 = _row_tiled_matmul(x_p, w1_p, tile_m=tile_n, out_dtype=jnp.bfloat16)
    h = _row_tiled_aggregate(
        adj_p, support1, b1_p, activation="relu", tile_m=tile_n, out_dtype=jnp.bfloat16
    )

    # TODO(synk): F.dropout is identity in eval mode; training-mode dropout
    # (pltpu.prng_seed + pltpu.stateful_bernoulli) not implemented here.

    # Layer 2: out = sigmoid(adj @ (h @ W2) + b2)
    support2 = _row_tiled_matmul(h, w2_p, tile_m=tile_n, out_dtype=jnp.bfloat16)
    out_p = _row_tiled_aggregate(
        adj_p, support2, b2_p, activation="sigmoid", tile_m=tile_n, out_dtype=jnp.float32
    )

    return out_p[:n, :nclass]


def init_gcn_params(key, nfeat, nhid, nclass):
    """Mirrors GraphConvolution.reset_parameters: uniform(-stdv, stdv),
    stdv = 1/sqrt(out_features); biases are 1-D like the PyTorch module."""
    k1, k2, k3, k4 = jax.random.split(key, 4)
    stdv1 = 1.0 / math.sqrt(nhid)
    stdv2 = 1.0 / math.sqrt(nclass)
    w1 = jax.random.uniform(k1, (nfeat, nhid), jnp.float32, -stdv1, stdv1)
    b1 = jax.random.uniform(k2, (nhid,), jnp.float32, -stdv1, stdv1)
    w2 = jax.random.uniform(k3, (nhid, nclass), jnp.float32, -stdv2, stdv2)
    b2 = jax.random.uniform(k4, (nclass,), jnp.float32, -stdv2, stdv2)
    return w1, b1, w2, b2


if __name__ == "__main__":
    # Small graph: 16 nodes, 32 input features, 32 hidden, 8 classes.
    N, NFEAT, NHID, NCLASS = 16, 32, 32, 8
    key = jax.random.PRNGKey(0)
    kx, kadj, kparams = jax.random.split(key, 3)

    x = jax.random.normal(kx, (N, NFEAT), jnp.float32)

    # Symmetric row-normalized adjacency with self-loops (typical GCN input).
    a = (jax.random.uniform(kadj, (N, N)) < 0.3).astype(jnp.float32)
    a = jnp.maximum(a, a.T) + jnp.eye(N, dtype=jnp.float32)
    adj = a / jnp.sum(a, axis=1, keepdims=True)

    w1, b1, w2, b2 = init_gcn_params(kparams, NFEAT, NHID, NCLASS)

    # tile_n=8 -> grid of 2 row tiles, exercising the pipelined grid path.
    out = gcn_forward(x, adj, w1, b1, w2, b2, tile_n=8)
    jax.block_until_ready(out)

    # Pure-fp32 JAX reference; bf16 MXU operands => loosened tolerance.
    ref_h = jnp.maximum(adj @ (x @ w1) + b1.reshape(1, -1), 0.0)
    ref = jax.nn.sigmoid(adj @ (ref_h @ w2) + b2.reshape(1, -1))
    assert out.shape == (N, NCLASS)
    max_err = float(jnp.max(jnp.abs(out - ref)))
    assert jnp.allclose(out, ref, atol=2e-2, rtol=0.0), max_err

    print("KERNEL_OK")
</pallas_src>

<mosaic_0001>
module attributes {stable_mosaic.version = 11 : i64} {
  func.func @_matmul_kernel(%arg0: i32, %arg1: memref<8x128xbf16, #tpu.memory_space<vmem>>, %arg2: memref<128x128xbf16, #tpu.memory_space<vmem>>, %arg3: memref<8x128xbf16, #tpu.memory_space<vmem>>) attributes {dimension_semantics = [#tpu.dimension_semantics<parallel>], iteration_bounds = array<i64: 2>, scalar_prefetch = 0 : i64, scratch_operands = 0 : i64, tpu.core_type = #tpu.core_type<tc>, window_params = [{transform_indices = @transform_0, window_bounds = array<i64: 8, 128>}, {pipeline_mode = #tpu.pipeline_mode<synchronous>, transform_indices = @transform_1, window_bounds = array<i64: 128, 128>}, {transform_indices = @transform_2, window_bounds = array<i64: 8, 128>}]} {
    %c0 = arith.constant 0 : index
    %c0_0 = arith.constant 0 : index
    %0 = vector.load %arg1[%c0, %c0_0] : memref<8x128xbf16, #tpu.memory_space<vmem>>, vector<8x128xbf16>
    %c0_1 = arith.constant 0 : index
    %c0_2 = arith.constant 0 : index
    %1 = vector.load %arg2[%c0_1, %c0_2] : memref<128x128xbf16, #tpu.memory_space<vmem>>, vector<128x128xbf16>
    %cst = arith.constant dense<0.000000e+00> : vector<8x128xf32>
    %2 = tpu.matmul %0, %1, %cst {dimension_numbers = #tpu.dot_dimension_numbers<[1], [0], [0], [1], [0, 0, 1, 1], [], []>} : vector<8x128xbf16>, vector<128x128xbf16>, vector<8x128xf32> -> vector<8x128xf32>
    %3 = arith.truncf %2 : vector<8x128xf32> to vector<8x128xbf16>
    %c0_3 = arith.constant 0 : index
    %c0_4 = arith.constant 0 : index
    %4 = vector.load %arg3[%c0_3, %c0_4] : memref<8x128xbf16, #tpu.memory_space<vmem>>, vector<8x128xbf16>
    tpu.vector_store %arg3[%c0_3, %c0_4], %3 {strides = array<i32>} : memref<8x128xbf16, #tpu.memory_space<vmem>>, vector<8x128xbf16>,
    return
  }
  func.func @transform_0(%arg0: i32) -> (i32, i32) {
    %c0_i32 = arith.constant 0 : i32
    %c0_i32_0 = arith.constant 0 : i32
    return %arg0, %c0_i32 : i32, i32
  }
  func.func @transform_1(%arg0: i32) -> (i32, i32) {
    %c0_i32 = arith.constant 0 : i32
    %c0_i32_0 = arith.constant 0 : i32
    %c0_i32_1 = arith.constant 0 : i32
    return %c0_i32, %c0_i32_0 : i32, i32
  }
  func.func @transform_2(%arg0: i32) -> (i32, i32) {
    %c0_i32 = arith.constant 0 : i32
    %c0_i32_0 = arith.constant 0 : i32
    return %arg0, %c0_i32 : i32, i32
  }
}

module attributes {stable_mosaic.version = 11 : i64} {
  func.func @kernel(%arg0: i32, %arg1: memref<8x16xbf16, #tpu.memory_space<vmem>>, %arg2: memref<16x128xbf16, #tpu.memory_space<vmem>>, %arg3: memref<1x128xf32, #tpu.memory_space<vmem>>, %arg4: memref<8x128xbf16, #tpu.memory_space<vmem>>) attributes {dimension_semantics = [#tpu.dimension_semantics<parallel>], iteration_bounds = array<i64: 2>, scalar_prefetch = 0 : i64, scratch_operands = 0 : i64, tpu.core_type = #tpu.core_type<tc>, window_params = [{transform_indices = @transform_0, window_bounds = array<i64: 8, 16>}, {pipeline_mode = #tpu.pipeline_mode<synchronous>, transform_indices = @transform_1, window_bounds = array<i64: 16, 128>}, {pipeline_mode = #tpu.pipeline_mode<synchronous>, transform_indices = @transform_2, window_bounds = array<i64: 1, 128>}, {transform_indices = @transform_3, window_bounds = array<i64: 8, 128>}]} {
    %c0 = arith.constant 0 : index
    %c0_0 = arith.constant 0 : index
    %0 = vector.load %arg1[%c0, %c0_0] : memref<8x16xbf16, #tpu.memory_space<vmem>>, vector<8x16xbf16>
    %c0_1 = arith.constant 0 : index
    %c0_2 = arith.constant 0 : index
    %1 = vector.load %arg2[%c0_1, %c0_2] : memref<16x128xbf16, #tpu.memory_space<vmem>>, vector<16x128xbf16>
    %cst = arith.constant dense<0.000000e+00> : vector<8x128xf32>
    %2 = tpu.matmul %0, %1, %cst {dimension_numbers = #tpu.dot_dimension_numbers<[1], [0], [0], [1], [0, 0, 1, 1], [], []>} : vector<8x16xbf16>, vector<16x128xbf16>, vector<8x128xf32> -> vector<8x128xf32>
    %c0_3 = arith.constant 0 : index
    %c0_4 = arith.constant 0 : index
    %3 = vector.load %arg3[%c0_3, %c0_4] : memref<1x128xf32, #tpu.memory_space<vmem>>, vector<1x128xf32>
    %4 = vector.broadcast %3 : vector<1x128xf32> to vector<8x128xf32>
    %5 = arith.addf %2, %4 : vector<8x128xf32>
    %cst_5 = arith.constant 0.000000e+00 : f32
    %6 = vector.broadcast %cst_5 : f32 to vector<8x128xf32>
    %7 = arith.maximumf %5, %6 : vector<8x128xf32>
    %8 = arith.truncf %7 : vector<8x128xf32> to vector<8x128xbf16>
    %c0_6 = arith.constant 0 : index
    %c0_7 = arith.constant 0 : index
    %9 = vector.load %arg4[%c0_6, %c0_7] : memref<8x128xbf16, #tpu.memory_space<vmem>>, vector<8x128xbf16>
    tpu.vector_store %arg4[%c0_6, %c0_7], %8 {strides = array<i32>} : memref<8x128xbf16, #tpu.memory_space<vmem>>, vector<8x128xbf16>,
    return
  }
  func.func @transform_0(%arg0: i32) -> (i32, i32) {
    %c0_i32 = arith.constant 0 : i32
    %c0_i32_0 = arith.constant 0 : i32
    return %arg0, %c0_i32 : i32, i32
  }
  func.func @transform_1(%arg0: i32) -> (i32, i32) {
    %c0_i32 = arith.constant 0 : i32
    %c0_i32_0 = arith.constant 0 : i32
    %c0_i32_1 = arith.constant 0 : i32
    return %c0_i32, %c0_i32_0 : i32, i32
  }
  func.func @transform_2(%arg0: i32) -> (i32, i32) {
    %c0_i32 = arith.constant 0 : i32
    %c0_i32_0 = arith.constant 0 : i32
    %c0_i32_1 = arith.constant 0 : i32
    return %c0_i32, %c0_i32_0 : i32, i32
  }
  func.func @transform_3(%arg0: i32) -> (i32, i32) {
    %c0_i32 = arith.constant 0 : i32
    %c0_i32_0 = arith.constant 0 : i32
    return %arg0, %c0_i32 : i32, i32
  }
}

module attributes {stable_mosaic.version = 11 : i64} {
  func.func @kernel(%arg0: i32, %arg1: memref<8x16xbf16, #tpu.memory_space<vmem>>, %arg2: memref<16x128xbf16, #tpu.memory_space<vmem>>, %arg3: memref<1x128xf32, #tpu.memory_space<vmem>>, %arg4: memref<8x128xf32, #tpu.memory_space<vmem>>) attributes {dimension_semantics = [#tpu.dimension_semantics<parallel>], iteration_bounds = array<i64: 2>, scalar_prefetch = 0 : i64, scratch_operands = 0 : i64, tpu.core_type = #tpu.core_type<tc>, window_params = [{transform_indices = @transform_0, window_bounds = array<i64: 8, 16>}, {pipeline_mode = #tpu.pipeline_mode<synchronous>, transform_indices = @transform_1, window_bounds = array<i64: 16, 128>}, {pipeline_mode = #tpu.pipeline_mode<synchronous>, transform_indices = @transform_2, window_bounds = array<i64: 1, 128>}, {transform_indices = @transform_3, window_bounds = array<i64: 8, 128>}]} {
    %c0 = arith.constant 0 : index
    %c0_0 = arith.constant 0 : index
    %0 = vector.load %arg1[%c0, %c0_0] : memref<8x16xbf16, #tpu.memory_space<vmem>>, vector<8x16xbf16>
    %c0_1 = arith.constant 0 : index
    %c0_2 = arith.constant 0 : index
    %1 = vector.load %arg2[%c0_1, %c0_2] : memref<16x128xbf16, #tpu.memory_space<vmem>>, vector<16x128xbf16>
    %cst = arith.constant dense<0.000000e+00> : vector<8x128xf32>
    %2 = tpu.matmul %0, %1, %cst {dimension_numbers = #tpu.dot_dimension_numbers<[1], [0], [0], [1], [0, 0, 1, 1], [], []>} : vector<8x16xbf16>, vector<16x128xbf16>, vector<8x128xf32> -> vector<8x128xf32>
    %c0_3 = arith.constant 0 : index
    %c0_4 = arith.constant 0 : index
    %3 = vector.load %arg3[%c0_3, %c0_4] : memref<1x128xf32, #tpu.memory_space<vmem>>, vector<1x128xf32>
    %4 = vector.broadcast %3 : vector<1x128xf32> to vector<8x128xf32>
    %5 = arith.addf %2, %4 : vector<8x128xf32>
    %6 = arith.negf %5 : vector<8x128xf32>
    %7 = math.exp %6 : vector<8x128xf32>
    %cst_5 = arith.constant 1.000000e+00 : f32
    %8 = vector.broadcast %cst_5 : f32 to vector<8x128xf32>
    %9 = arith.addf %8, %7 : vector<8x128xf32>
    %10 = arith.divf %8, %9 : vector<8x128xf32>
    %c0_6 = arith.constant 0 : index
    %c0_7 = arith.constant 0 : index
    %11 = vector.load %arg4[%c0_6, %c0_7] : memref<8x128xf32, #tpu.memory_space<vmem>>, vector<8x128xf32>
    tpu.vector_store %arg4[%c0_6, %c0_7], %10 {strides = array<i32>} : memref<8x128xf32, #tpu.memory_space<vmem>>, vector<8x128xf32>,
    return
  }
  func.func @transform_0(%arg0: i32) -> (i32, i32) {
    %c0_i32 = arith.constant 0 : i32
    %c0_i32_0 = arith.constant 0 : i32
    return %arg0, %c0_i32 : i32, i32
  }
  func.func @transform_1(%arg0: i32) -> (i32, i32) {
    %c0_i32 = arith.constant 0 : i32
    %c0_i32_0 = arith.constant 0 : i32
    %c0_i32_1 = arith.constant 0 : i32
    return %c0_i32, %c0_i32_0 : i32, i32
  }
  func.func @transform_2(%arg0: i32) -> (i32, i32) {
    %c0_i32 = arith.constant 0 : i32
    %c0_i32_0 = arith.constant 0 : i32
    %c0_i32_1 = arith.constant 0 : i32
    return %c0_i32, %c0_i32_0 : i32, i32
  }
  func.func @transform_3(%arg0: i32) -> (i32, i32) {
    %c0_i32 = arith.constant 0 : i32
    %c0_i32_0 = arith.constant 0 : i32
    return %arg0, %c0_i32 : i32, i32
  }
}

</mosaic_0001>

<bundles_post_ra>
// kernel: gcn_forward.4
= control target key start
LH: loop header
LB: loop body
LE: loop exit
PB: predicated region body
PF: predicated region fallthrough
CT: control target
= control target key end

     0   :  { %s352_s9 = smov 0   ;;  %s393_s0 = inlined_call_operand.vmem [shape: bf16[16,128], index: 0, kind: input, shape index: {}]   ;;  %s394_s1 = inlined_call_operand.vmem [shape: bf16[128,128], index: 1, kind: input, shape index: {}]   ;;  %s395_s2 = inlined_call_operand.vmem [shape: bf16[16,128], index: 2, kind: output, shape index: {}]  }
   0x1 LB: > { %s272_s10 = sadd.s32 4294967295, %s335_s9   ;;  %p276_p0 = scmp.ge.s32.totalorder %s335_s9, 1  ;;  %s335_s9 = sphi %s352_s9, %s12_s9  }
   0x2   : > { %p111_p1 = scmp.lt.s32.totalorder %s335_s9, 3 }
   0x4   : > { %p112_p2 = pnand %p276_p0, %p111_p1 }
   0x5   : > { %p131_p3 = scmp.lt.s32.totalorder (!%p112_p2), %s272_s10, 1 }
   0x6   : > { %115 = sbr.rel (%p112_p2) target bundleno = 177 (0xb1), region = 28 }
   0xb   : > { %v320_v0 = vld [vmem:[%s394_s1 + $0x38] sm:$0xff]  ;;  %v319_v1 = vld [vmem:[%s394_s1 + $0x30] sm:$0xff]  ;;  %v318_v2 = vld [vmem:[%s394_s1 + $0x28] sm:$0xff]  ;;  %s397_s10 = smov (!%p131_p3, %s272_s10), 1 }
   0xc   : > { %204 = vmatpush.bf16.msra.mxu0 %v320_v0  ;;  %v317_v3 = vld [vmem:[%s394_s1 + $0x20] sm:$0xff]  ;;  %v316_v4 = vld [vmem:[%s394_s1 + $0x18] sm:$0xff]  ;;  %v315_v5 = vld [vmem:[%s394_s1 + $0x10] sm:$0xff]  ;;  %s277_s25 = sshll.u32 %s397_s10, 2 }
   0xd   : > { %v314_v6 = vld [vmem:[%s394_s1 + $0x8] sm:$0xff]  ;;  %v313_v7 = vld [vmem:[%s394_s1] sm:$0xff]  ;;  %s134_s30 = scalar_lea.vmem %s393_s0, %s277_s25  ;;  %s138_s5 = scalar_lea.vmem %s395_s2, %s277_s25 }
   0xe   : > { %v139_v8 = vld [vmem:[%s134_s30] sm:$0xf] }
  0x10   : > { %205 = vmatpush.bf16.msra.mxu0 %v319_v1 }
  0x14   : > { %206 = vmatpush.bf16.msra.mxu0 %v318_v2 }
  0x18   : > { %207 = vmatpush.bf16.msra.mxu0 %v317_v3 }
  0x1c   : > { %208 = vmatpush.bf16.msra.mxu0 %v316_v4 }
  0x20   : > { %209 = vmatpush.bf16.msra.mxu0 %v315_v5 }
  0x24   : > { %210 = vmatpush.bf16.msra.mxu0 %v314_v6 }
  0x28   : > { %211 = vmatpush.bf16.msra.mxu0 %v313_v7 }
  0x2b   : > { %212 = vmatmul.bf16.vlgmr.msra.gmra.mxu0 %v139_v8 }
  0xa8   : > { %v213_v9 = vpop.f32.mrf.mxu0 }
  0xa9   : > { %v217_v10 = vpack.c.bf16 %v213_v9, %v213_v9 }
  0xab   : > { %218 = vst [vmem:[%s138_s5] sm:$0xf] %v217_v10 }
  0xb0   : > { %v215_v11 = vpop.f32.mrf.mxu0 }
  0xb1 PF: > { %s12_s9 = sadd.s32 1, %s335_s9  }
  0xb2   : > { %p9_p4 = scmp.ge.s32.totalorder %s12_s9, 4  }
  0xb4   :  { %11 = sbr.rel (!%p9_p4) target bundleno = 1 (0x1), region = 58 }

// kernel: gcn_forward.7
= control target key start
LH: loop header
LB: loop body
LE: loop exit
PB: predicated region body
PF: predicated region fallthrough
CT: control target
= control target key end

     0   :  { %s327_s12 = smov 0   ;;  %s350_s0 = inlined_call_operand.vmem [shape: bf16[16,16], index: 0, kind: input, shape index: {}]   ;;  %s351_s1 = inlined_call_operand.vmem [shape: bf16[16,128], index: 1, kind: input, shape index: {}]   ;;  %s352_s2 = inlined_call_operand.vmem [shape: f32[1,128], index: 2, kind: input, shape index: {}]   ;;  %s353_s3 = inlined_call_operand.vmem [shape: f32[16,128], index: 3, kind: output, shape index: {}]  }
   0x1 LB: > { %s270_s13 = sadd.s32 4294967295, %s305_s12   ;;  %p274_p0 = scmp.ge.s32.totalorder %s305_s12, 1  ;;  %s305_s12 = sphi %s327_s12, %s13_s12  }
   0x2   : > { %p136_p1 = scmp.lt.s32.totalorder %s305_s12, 3 }
   0x4   : > { %p137_p2 = pnand %p274_p0, %p136_p1 }
   0x5   : > { %p158_p3 = scmp.lt.s32.totalorder (!%p137_p2), %s270_s13, 1 }
   0x6   : > { %140 = sbr.rel (%p137_p2) target bundleno = 172 (0xac), region = 32 }
   0xb   : > { %v285_v0 = vld [vmem:[%s351_s1] sm:$0xff]  ;;  %s355_s13 = smov (!%p158_p3, %s270_s13), 1  ;;  %vm180_vm0 = vcmask 130048  }
   0xc   : > { %191 = vmatpush.bf16.msra.mxu0 %v285_v0  ;;  %s275_s16 = sshll.u32 %s355_s13, 2  ;;  %v294_v2 = vld [vmem:[%s352_s2] ss:$0 sm:$0xff]  ;;  %s276_s22 = sshll.u32 %s355_s13, 3 }
   0xd   : > { %s161_s19 = scalar_lea.vmem %s350_s0, %s275_s16  ;;  %s165_s25 = scalar_lea.vmem %s353_s3, %s276_s22 }
   0xe   : > { %v167_v1 = vld [vmem:[%s161_s19] sm:$0xf] }
   0xf   : > { %281 = vmatmul.msk.bf16.vlgmr.msra.gmra.mxu0 %vm180_vm0, %v167_v1 }
  0x8c   : > { %v193_v3 = vpop.f32.mrf.mxu0 }
  0x8d   : > { %v194_v4 = vadd.f32 %v294_v2, %v193_v3 }
  0x8f   : > { %v282_v5 = vmul.f32 -1.442695, %v194_v4 }
  0x91   : > { %295 = vpow2.f32 %v282_v5 }
  0x94   : > { %v195_v6 = vpop.f32.mrf.mxu0 }
  0x97   : > { %v296_v7 = vpop.eup %295 }
  0x98   : > { %v200_v8 = vadd.f32 1.0, %v296_v7 }
  0x9a   : > { %297 = vrcp.f32 %v200_v8  ;;  %v212_v12 = vand.u32 2147483648, %v200_v8  ;;  %v210_v14 = vand.u32 2147483647, %v200_v8  ;;  %vm206_vm2 = vweird.f32 %v200_v8 }
  0x9c   : > { %v213_v16 = vor.u32 1.1754944e-38, %v212_v12  ;;  %vm211_vm4 = vcmp.eq.f32.partialorder %v210_v14, 8.507059e+37 }
  0xa0   : > { %v298_v9 = vpop.eup %297 }
  0xa1   : > { %v202_v10 = vmul.f32 %v298_v9, %v200_v8  ;;  %vm207_vm1 = vweird.f32 %v298_v9 }
  0xa2   : > { %vm208_vm3 = vmor %vm206_vm2, %vm207_vm1 }
  0xa3   : > { %v203_v11 = vsub.f32 1.0, %v202_v10 }
  0xa5   : > { %v204_v13 = vmul.f32 %v298_v9, %v203_v11 }
  0xa7   : > { %v205_v15 = vadd.f32 %v298_v9, %v204_v13 }
  0xa9   : > { %v209_v17 = vsel %vm208_vm3, %v298_v9, %v205_v15 }
  0xaa   : > { %v214_v18 = vsel %vm211_vm4, %v213_v16, %v209_v17 }
  0xab   : > { %216 = vst [vmem:[%s165_s25] sm:$0xff] %v214_v18 }
  0xac PF: > { %s13_s12 = sadd.s32 1, %s305_s12  }
  0xad   : > { %p10_p4 = scmp.ge.s32.totalorder %s13_s12, 4  }
  0xaf   :  { %12 = sbr.rel (!%p10_p4) target bundleno = 1 (0x1), region = 62 }

// kernel: gcn_forward.5
= control target key start
LH: loop header
LB: loop body
LE: loop exit
PB: predicated region body
PF: predicated region fallthrough
CT: control target
= control target key end

     0   :  { %s305_s12 = smov 0   ;;  %s322_s0 = inlined_call_operand.vmem [shape: bf16[16,16], index: 0, kind: input, shape index: {}]   ;;  %s323_s1 = inlined_call_operand.vmem [shape: bf16[16,128], index: 1, kind: input, shape index: {}]   ;;  %s324_s2 = inlined_call_operand.vmem [shape: f32[1,128], index: 2, kind: input, shape index: {}]   ;;  %s325_s3 = inlined_call_operand.vmem [shape: bf16[16,128], index: 3, kind: output, shape index: {}]  }
   0x1 LB: > { %s253_s13 = sadd.s32 4294967295, %s283_s12   ;;  %p257_p0 = scmp.ge.s32.totalorder %s283_s12, 1  ;;  %s283_s12 = sphi %s305_s12, %s13_s12  }
   0x2   : > { %p136_p1 = scmp.lt.s32.totalorder %s283_s12, 3 }
   0x4   : > { %p137_p2 = pnand %p257_p0, %p136_p1 }
   0x5   : > { %p158_p3 = scmp.lt.s32.totalorder (!%p137_p2), %s253_s13, 1 }
   0x6   : > { %140 = sbr.rel (%p137_p2) target bundleno = 149 (0x95), region = 32 }
   0xb   : > { %v267_v0 = vld [vmem:[%s323_s1] sm:$0xff]  ;;  %s327_s13 = smov (!%p158_p3, %s253_s13), 1  ;;  %vm180_vm0 = vcmask 130048  }
   0xc   : > { %191 = vmatpush.bf16.msra.mxu0 %v267_v0  ;;  %s258_s16 = sshll.u32 %s327_s13, 2  ;;  %v276_v2 = vld [vmem:[%s324_s2] ss:$0 sm:$0xff] }
   0xd   : > { %s161_s19 = scalar_lea.vmem %s322_s0, %s258_s16  ;;  %s165_s24 = scalar_lea.vmem %s325_s3, %s258_s16 }
   0xe   : > { %v167_v1 = vld [vmem:[%s161_s19] sm:$0xf] }
   0xf   : > { %264 = vmatmul.msk.bf16.vlgmr.msra.gmra.mxu0 %vm180_vm0, %v167_v1 }
  0x8c   : > { %v193_v3 = vpop.f32.mrf.mxu0 }
  0x8d   : > { %v194_v4 = vadd.f32 %v276_v2, %v193_v3 }
  0x8f   : > { %v197_v5 = vmax.f32 %v194_v4, 0.0 }
  0x91   : > { %v198_v6 = vpack.c.bf16 %v197_v5, %v197_v5 }
  0x93   : > { %199 = vst [vmem:[%s165_s24] sm:$0xf] %v198_v6 }
  0x94   : > { %v195_v7 = vpop.f32.mrf.mxu0 }
  0x95 PF: > { %s13_s12 = sadd.s32 1, %s283_s12  }
  0x96   : > { %p10_p4 = scmp.ge.s32.totalorder %s13_s12, 4  }
  0x98   :  { %12 = sbr.rel (!%p10_p4) target bundleno = 1 (0x1), region = 62 }

</bundles_post_ra>
